<compile_context>
chip_gen: v5e
topology: v5e:2x2
jax: 0.10.0
libtpu: 0.0.40
codegen_flags: <defaults>
</compile_context>

<pallas_src>
import functools
from math import exp

import jax
import jax.numpy as jnp
from jax.experimental import pallas as pl
from jax.experimental.pallas import tpu as pltpu


# ----------------------------------------------------------------------------
# Scalar helper (same numerics as the PyTorch reference)
# ----------------------------------------------------------------------------
def get_scale_param(p, tol=1e-9) -> float:
    """Solve a - a*exp(-1/a) = 1 - p by fixed-point iteration."""
    assert p != 0 and p != 1
    p = 1 - p
    a = 0.5 / (1 - p)
    err = 1 + tol
    while err > tol:
        a = p / (1 - exp(-1 / a))
        err = abs(p - (a - a * exp(-1 / a)))
    return a


# ----------------------------------------------------------------------------
# Kernels
# ----------------------------------------------------------------------------
def _tail_mask_kernel(x_ref, t_ref, o_ref, *, tile_f, sub_f, groups):
    """Random mode: keep lane l iff its 1-based logical column < int threshold.

    t_ref block is (tile_r, groups) int32.  For lane-packed narrow-feature
    inputs (groups > 1) each physical row holds `groups` logical rows of
    `sub_f` columns; t_ref[:, s] is already offset by s * sub_f in the wrapper.
    """
    j = pl.program_id(1)
    x = x_ref[...]
    # 0-based global lane index as a (1, tile_f) int32 row; the compare
    # broadcasts against the (tile_r, 1) threshold column (pure int32 VPU).
    gl = jax.lax.broadcasted_iota(jnp.int32, (1, x.shape[-1]), 1) + j * tile_f
    thr = t_ref[:, 0:1]
    for s in range(1, groups):                      # static; 0 iters when unpacked
        thr = jnp.where(gl >= s * sub_f, t_ref[:, s:s + 1], thr)
    keep = (gl + 1) < thr
    o_ref[...] = jnp.where(keep, x, jnp.zeros_like(x))


def _first_k_kernel(x_ref, o_ref, *, tile_f, k):
    """first_k mode.  k is static, so fully-kept / boundary / fully-dropped
    feature blocks are distinguished with pl.when; fully-dropped blocks never
    read x (and never fetch it from HBM thanks to the clamped index_map)."""
    j = pl.program_id(1)
    n_keep = k // tile_f               # feature blocks that are fully kept
    last = (k - 1) // tile_f           # last block containing kept columns

    @pl.when(j < n_keep)
    def _():
        o_ref[...] = x_ref[...]

    @pl.when(j > last)
    def _():
        o_ref[...] = jnp.zeros_like(o_ref)

    @pl.when((j >= n_keep) & (j <= last))
    def _():
        x = x_ref[...]
        col = jax.lax.broadcasted_iota(jnp.int32, (1, x.shape[-1]), 1) + j * tile_f
        o_ref[...] = jnp.where(col < k, x, jnp.zeros_like(x))


# ----------------------------------------------------------------------------
# Tiling heuristics (generation-portable)
# ----------------------------------------------------------------------------
_MAX_BLOCK_BYTES = 2 << 20   # per x block; x+out double-buffered ~8 MiB total
_LANE_PAD_BYTES = 512        # (tile_r, <=128) i32 threshold block pads to 128
                             # lanes in VMEM -> 512 B per row per buffer
_COMPILER_PARAMS = pltpu.CompilerParams(
    dimension_semantics=("parallel", "parallel"),
    # Explicit scoped-VMEM budget: valid on every generation (v7x 64 MiB
    # physical; overrides v5e's 16 MiB default scoped limit with headroom).
    vmem_limit_bytes=32 << 20,
)


def _round_up(n, m):
    return (n + m - 1) // m * m


def _choose_tiles(rows, feat, itemsize, lane_pad_bytes):
    sub = max(8, 32 // itemsize)                      # sublane packing multiple
    cap128 = max(128, (_MAX_BLOCK_BYTES // (sub * itemsize)) // 128 * 128)
    if feat % 128 == 0 or feat * itemsize * sub > _MAX_BLOCK_BYTES:
        # Lane-dense 128-multiple tile; Pallas masks the ragged edge block.
        tile_f = min(_round_up(feat, 128), cap128)
    else:
        tile_f = feat                                 # small non-128-multiple dim
    # Row tile from the per-block budget, counting the lane-padded threshold.
    per_row = tile_f * itemsize + lane_pad_bytes
    tile_r = max(sub, (_MAX_BLOCK_BYTES // per_row) // sub * sub)
    tile_r = min(tile_r, _round_up(rows, sub))
    # v7x has two TensorCores: avoid a single-step grid when we can split.
    if rows <= tile_r and feat <= tile_f:
        if tile_f % 256 == 0:
            tile_f //= 2
        elif tile_r >= 2 * sub:
            tile_r = _round_up((rows + 1) // 2, sub)
    return tile_r, tile_f


# ----------------------------------------------------------------------------
# pallas_call wrappers
# ----------------------------------------------------------------------------
def _apply_tail_mask(x2d, t2d, sub_f, groups):
    """x2d: (R, Fp); t2d: (R, groups) int32 per-row (per-group) thresholds."""
    R, Fp = x2d.shape
    itemsize = jnp.dtype(x2d.dtype).itemsize
    tile_r, tile_f = _choose_tiles(R, Fp, itemsize, _LANE_PAD_BYTES)
    grid = (pl.cdiv(R, tile_r), pl.cdiv(Fp, tile_f))
    # TODO(synk): random mode could also skip the HBM read of feature blocks
    # that are fully dropped for every row in the tile (scalar-prefetched
    # per-row-tile max threshold + clamped index_map); only pays off when Fp
    # spans several feature blocks.
    kernel = functools.partial(_tail_mask_kernel, tile_f=tile_f,
                               sub_f=sub_f, groups=groups)
    return pl.pallas_call(
        kernel,
        out_shape=jax.ShapeDtypeStruct((R, Fp), x2d.dtype),
        grid=grid,
        in_specs=[
            pl.BlockSpec((tile_r, tile_f), lambda i, j: (i, j)),
            pl.BlockSpec((tile_r, groups), lambda i, j: (i, 0)),
        ],
        out_specs=pl.BlockSpec((tile_r, tile_f), lambda i, j: (i, j)),
        compiler_params=_COMPILER_PARAMS,
    )(x2d, t2d)


def _apply_first_k(x2d, k):
    """Keep the first k columns, zero the rest; fully-dropped feature blocks
    are written without ever being read from HBM."""
    R, F = x2d.shape
    itemsize = jnp.dtype(x2d.dtype).itemsize
    tile_r, tile_f = _choose_tiles(R, F, itemsize, 0)   # no threshold input
    if tile_f % 128 == 0:
        # Only the first ceil(k/128)*128 columns ever need to be read.
        tile_f = min(tile_f, _round_up(k, 128))
    last = (k - 1) // tile_f
    grid = (pl.cdiv(R, tile_r), pl.cdiv(F, tile_f))
    kernel = functools.partial(_first_k_kernel, tile_f=tile_f, k=k)
    return pl.pallas_call(
        kernel,
        out_shape=jax.ShapeDtypeStruct((R, F), x2d.dtype),
        grid=grid,
        in_specs=[
            # Clamp tail blocks onto the last needed block: the input block
            # index stops changing, so Pallas elides those DMAs entirely.
            pl.BlockSpec((tile_r, tile_f), lambda i, j: (i, jnp.minimum(j, last))),
        ],
        out_specs=pl.BlockSpec((tile_r, tile_f), lambda i, j: (i, j)),
        compiler_params=_COMPILER_PARAMS,
    )(x2d)


# ----------------------------------------------------------------------------
# Module-style wrapper reproducing TailDropout.forward semantics
# (batch_dim=0, dropout_dim=-1)
# ----------------------------------------------------------------------------
class TailDropout:
    def __init__(self, p: float = 0.5):
        if p < 0 or p > 1:
            raise ValueError(f"dropout probability has to be between 0 and 1, but got {p}")
        self.training = True
        self.set_p(p)
        self.set_k(None)

    def set_p(self, p):
        self._p = p
        self.scale = None if (p == 0 or p == 1) else get_scale_param(p)

    def set_k(self, k):
        self.k = k

    def train(self, mode=True):
        self.k = None
        self.training = mode
        return self

    def eval(self):
        self.k = None
        self.training = False
        return self

    def __call__(self, x, key=None):
        n_features = x.shape[-1]
        if self.k is None:
            if self.training:
                mode = ("straight-through" if self._p == 0
                        else ("zero" if self._p == 1 else "random"))
            else:
                mode = "straight-through"
        elif self.k == n_features:
            mode = "straight-through"
        elif self.k == 0:
            mode = "zero"
        elif self.k > n_features:
            raise ValueError(f"TailDropout k ({self.k}) is greater than n_features ({n_features})")
        else:
            mode = "first_k"

        if mode == "straight-through":
            return x
        if mode == "zero":
            return jnp.zeros_like(x)                 # write-only, never reads x

        rows = x.reshape(-1, n_features)
        R = rows.shape[0]

        if mode == "first_k":
            return _apply_first_k(rows, int(self.k)).reshape(x.shape)

        # ---------------- random mode ----------------
        assert key is not None, "random mode needs a PRNG key"
        B = x.shape[0]
        u = jax.random.uniform(key, (B,), dtype=jnp.float32)
        # keep col c (1-based)  <=>  1-exp(-c/(scale*F)) < u  <=>  c < -scale*F*log1p(-u)
        # (mathematically equivalent to the exp-CDF test; not bit-identical to
        #  PyTorch for columns landing exactly on the threshold)
        t = -jnp.float32(self.scale * n_features) * jnp.log1p(-u)
        t_int = jnp.ceil(t).astype(jnp.int32)        # c < t  <=>  c < ceil(t)
        t_rows = jnp.repeat(t_int, R // B)           # broadcast over middle dims

        groups, sub_f, x2d = 1, n_features, rows
        t2d = t_rows[:, None]
        if n_features < 128 and 128 % n_features == 0:
            g = 128 // n_features
            if g > 1 and R % g == 0:
                # Lane-pack g logical rows per 128-lane physical row (free
                # row-major reshape) so loads/stores are lane-dense.
                groups, sub_f = g, n_features
                x2d = rows.reshape(R // g, g * n_features)
                t2d = (t_rows.reshape(R // g, g)
                       + (jnp.arange(g, dtype=jnp.int32) * n_features)[None, :])

        return _apply_tail_mask(x2d, t2d, sub_f, groups).reshape(x.shape)


# ----------------------------------------------------------------------------
# Pure-JAX reference (same threshold math; equivalent to the PyTorch exp-CDF)
# ----------------------------------------------------------------------------
def _reference_threshold(x2d, thresh_rows):
    F = x2d.shape[-1]
    col = jnp.arange(1, F + 1, dtype=jnp.float32)[None, :]
    return jnp.where(col < thresh_rows, x2d, jnp.zeros_like(x2d))


if __name__ == "__main__":
    key = jax.random.PRNGKey(0)
    kx, ku, kx3, ku3, kxp, kup = jax.random.split(key, 6)

    # --- 2-D random mode (main hot path) ---
    B, F = 16, 256
    x = jax.random.normal(kx, (B, F), dtype=jnp.float32)
    drop = TailDropout(p=0.5)
    y = jax.block_until_ready(drop(x, key=ku))
    u = jax.random.uniform(ku, (B,), dtype=jnp.float32)
    thresh = (-jnp.float32(drop.scale * F) * jnp.log1p(-u))[:, None]
    assert jnp.array_equal(y, _reference_threshold(x, thresh)), "random-mode mismatch"

    # --- non-multiple-of-8 batch (ragged row blocks, no jnp.pad copy) ---
    xp = jax.random.normal(kxp, (10, F), dtype=jnp.float32)
    yp = jax.block_until_ready(drop(xp, key=kup))
    up = jax.random.uniform(kup, (10,), dtype=jnp.float32)
    tp = (-jnp.float32(drop.scale * F) * jnp.log1p(-up))[:, None]
    assert jnp.array_equal(yp, _reference_threshold(xp, tp)), "ragged-rows mismatch"

    # --- 3-D input with narrow features (lane-packed path, F=32) ---
    x3 = jax.random.normal(kx3, (4, 8, 32), dtype=jnp.float32)
    y3 = jax.block_until_ready(drop(x3, key=ku3))
    u3 = jax.random.uniform(ku3, (4,), dtype=jnp.float32)
    t3 = -jnp.float32(drop.scale * 32) * jnp.log1p(-u3)
    col3 = jnp.arange(1, 33, dtype=jnp.float32)[None, None, :]
    y3_ref = jnp.where(col3 < t3[:, None, None], x3, jnp.zeros_like(x3))
    assert jnp.array_equal(y3, y3_ref), "3-D random-mode mismatch"

    # --- eval / straight-through ---
    drop.eval()
    assert jnp.array_equal(jax.block_until_ready(drop(x)), x)

    # --- first_k mode (dropped tail blocks never read from HBM) ---
    drop.set_k(10)
    y_k = jax.block_until_ready(drop(x))
    assert float(jnp.abs(y_k[:, 10:]).sum()) == 0.0
    assert jnp.array_equal(y_k[:, :10], x[:, :10])

    # --- zero mode ---
    drop.set_k(0)
    assert float(jnp.abs(jax.block_until_ready(drop(x))).sum()) == 0.0

    print("KERNEL_OK")
</pallas_src>

<mosaic_0001>
module attributes {stable_mosaic.version = 11 : i64} {
  func.func @_tail_mask_kernel(%arg0: i32, %arg1: i32, %arg2: memref<16x128xf32, #tpu.memory_space<vmem>>, %arg3: memref<16x1xi32, #tpu.memory_space<vmem>>, %arg4: memref<16x128xf32, #tpu.memory_space<vmem>>) attributes {dimension_semantics = [#tpu.dimension_semantics<parallel>, #tpu.dimension_semantics<parallel>], iteration_bounds = array<i64: 1, 2>, scalar_prefetch = 0 : i64, scratch_operands = 0 : i64, tpu.core_type = #tpu.core_type<tc>, window_params = [{transform_indices = @transform_0, window_bounds = array<i64: 16, 128>}, {transform_indices = @transform_1, window_bounds = array<i64: 16, 1>}, {transform_indices = @transform_2, window_bounds = array<i64: 16, 128>}]} {
    %c0 = arith.constant 0 : index
    %c0_0 = arith.constant 0 : index
    %0 = vector.load %arg2[%c0, %c0_0] : memref<16x128xf32, #tpu.memory_space<vmem>>, vector<16x128xf32>
    %1 = tpu.iota {dimensions = array<i32: 1>} : vector<1x128xi32>
    %c128_i32 = arith.constant 128 : i32
    %2 = arith.muli %arg1, %c128_i32 : i32
    %3 = vector.broadcast %2 : i32 to vector<1x128xi32>
    %4 = arith.addi %1, %3 : vector<1x128xi32>
    %c0_1 = arith.constant 0 : index
    %c0_2 = arith.constant 0 : index
    %5 = vector.load %arg3[%c0_1, %c0_2] : memref<16x1xi32, #tpu.memory_space<vmem>>, vector<16x1xi32>
    %c1_i32 = arith.constant 1 : i32
    %6 = vector.broadcast %c1_i32 : i32 to vector<1x128xi32>
    %7 = arith.addi %4, %6 : vector<1x128xi32>
    %8 = vector.broadcast %7 : vector<1x128xi32> to vector<16x128xi32>
    %9 = vector.broadcast %5 : vector<16x1xi32> to vector<16x128xi32>
    %10 = arith.cmpi slt, %8, %9 : vector<16x128xi32>
    %cst = arith.constant 0.000000e+00 : f32
    %11 = vector.broadcast %cst : f32 to vector<16x128xf32>
    %12 = arith.select %10, %0, %11 : vector<16x128xi1>, vector<16x128xf32>
    %c0_3 = arith.constant 0 : index
    %c0_4 = arith.constant 0 : index
    %13 = vector.load %arg4[%c0_3, %c0_4] : memref<16x128xf32, #tpu.memory_space<vmem>>, vector<16x128xf32>
    tpu.vector_store %arg4[%c0_3, %c0_4], %12 {strides = array<i32>} : memref<16x128xf32, #tpu.memory_space<vmem>>, vector<16x128xf32>,
    return
  }
  func.func @transform_0(%arg0: i32, %arg1: i32) -> (i32, i32) {
    %c0_i32 = arith.constant 0 : i32
    return %arg0, %arg1 : i32, i32
  }
  func.func @transform_1(%arg0: i32, %arg1: i32) -> (i32, i32) {
    %c0_i32 = arith.constant 0 : i32
    %c0_i32_0 = arith.constant 0 : i32
    return %arg0, %c0_i32 : i32, i32
  }
  func.func @transform_2(%arg0: i32, %arg1: i32) -> (i32, i32) {
    %c0_i32 = arith.constant 0 : i32
    return %arg0, %arg1 : i32, i32
  }
}

</mosaic_0001>

<bundles_post_ra>
// kernel: tpu_custom_call.1
= control target key start
LH: loop header
LB: loop body
LE: loop exit
PB: predicated region body
PF: predicated region fallthrough
CT: control target
= control target key end

     0   :  { %7 = vsyncpa [#allocation3], 0  ;;  %s694_s0 = inlined_call_operand.hbm [shape: f32[16,256], index: 0, kind: input, shape index: {}]   ;;  %s695_s1 = inlined_call_operand.vmem [shape: s32[16,1], index: 1, kind: input, shape index: {}]   ;;  %s696_s2 = inlined_call_operand.hbm [shape: f32[16,256], index: 2, kind: output, shape index: {}]  }
   0x1   :  { %9 = vsyncpa [#allocation3 + $0x1], 0 }
   0x2   :  { %10 = vsyncpa [#allocation4], 0 }
   0x3   :  { %12 = vsyncpa [#allocation4 + $0x1], 0  ;;  %s567_s9 = smov 0   ;;  %s569_s10 = smov 0  }
   0x4   :  { %s571_s11 = smov 0   ;;  %s573_s12 = smov 0  }
   0x5   :  { %s575_s13 = smov 0   ;;  %s577_s14 = smov 0  }
   0x6 LB: > { %s346_s15 = sadd.s32 4294967295, %s543_s14   ;;  %s347_s16 = sadd.s32 4294967294, %s543_s14   ;;  %s543_s14 = sphi %s577_s14, %s18_s14   ;;  %s539_s13 = sphi %s575_s13, %s705_s13   ;;  %s535_s12 = sphi %s573_s12, %s704_s12   ;;  %s531_s11 = sphi %s571_s11, %s703_s11   ;;  %s527_s10 = sphi %s569_s10, %s702_s10   ;;  %s523_s9 = sphi %s567_s9, %s701_s9  }
   0x7   : > { %s27_s17 = sadd.s32 1, %s539_s13  ;;  %s39_s18 = sadd.s32 1, %s531_s11 }
   0x8   : > { %p28_p0 = scmp.ge.s32.totalorder %s27_s17, 2  ;;  %p46_p1 = scmp.ne.s32.totalorder %s531_s11, %s527_s10 }
   0x9   : > { %p47_p2 = scmp.eq.s32.totalorder %s543_s14, 0  ;;  %p52_p3 = scmp.ne.s32.totalorder %s527_s10, %s523_s9 }
   0xa   : > { %s707_s17 = smov (%p28_p0, %s27_s17), 0  ;;  %p53_p5 = scmp.eq.s32.totalorder %s346_s15, 0 }
   0xb   : > { %p608_p4 = por %p47_p2, %p46_p1  ;;  %s35_s20 = ssub.s32 %s539_s13, %s707_s17 }
   0xc   : > { %p104_p6 = scmp.eq.s32.totalorder %s346_s15, 1  ;;  %p37_p7 = scmp.eq.s32.totalorder %s35_s20, 0 }
   0xd   : > { %p614_p8 = por %p53_p5, %p52_p3  ;;  %p110_p10 = scmp.eq.s32.totalorder %s347_s16, 1 }
   0xe   : > { %p618_p9 = por %p104_p6, %p46_p1  ;;  %p350_p12 = scmp.ge.s32.totalorder %s543_s14, 2 }
   0xf   : > { %s623_s23 = scalar_select %p37_p7, %s531_s11, %s39_s18  }
  0x10   : > { %p625_p11 = por %p110_p10, %p52_p3  ;;  %p373_p13 = scmp.lt.s32.totalorder %s543_s14, 2 }
  0x11   : > { %s139_s25 = sand.u32 1, %s531_s11   ;;  %s352_s27 = sshll.u32 %s539_s13, 3 }
  0x12   : > { %s351_s26 = sshll.u32 %s139_s25, 4  ;;  %s150_s30 = scalar_lea.hbm %s694_s0, %s352_s27 }
  0x13   : > { %s143_s3 = scalar_lea.vmem [#allocation2], %s351_s26  ;;  %s151_s5 = sshll.u32 %s150_s30, 4  ;;  %s152_s5 = int_to_ptr.hbm [resolvable:$true] %s151_s5 }
  0x14   : > { %s153_s4 = sshll.u32 %s143_s3, 4  ;;  %p366_p0 = pnand %p373_p13, %p608_p4  ;;  %s154_s4 = int_to_ptr.vmem [resolvable:$true] %s153_s4 }
  0x15   : > { %s140_s6 = scalar_lea.sflag [#allocation3], %s139_s25  ;;  %s545_s7 = smov 256  }
  0x16   : > { %s546_s8 = smov 128   ;;  %s547_s15 = smov 8  }
  0x17   : > { %368 = dma.hbm_to_vmem [thread:$0]  (!%p366_p0), %s152_s5, 256, %s154_s4, %s140_s6, %s545_s7, %s546_s8, %s547_s15  }
  0x18   : > { %p353_p1 = scmp.ge.s32.totalorder %s543_s14, 1  ;;  %p161_p2 = scmp.lt.s32.totalorder %s543_s14, 3 }
  0x1a   : > { %p162_p3 = pnand %p353_p1, %p161_p2 }
  0x1b   : > { %s641_s16 = sand.u32 (!%p162_p3), 1, %s527_s10  }
  0x1c   : > { %165 = sbr.rel (%p162_p3) target bundleno = 166 (0xa6), region = 28  ;;  %s354_s18 = sshll.u32 (!%p162_p3), %s641_s16, 4 }
  0x1d   : > { %s168_s20 = scalar_lea.sflag (!%p162_p3), [#allocation3], %s641_s16  ;;  %s171_s26 = scalar_lea.vmem (!%p162_p3), [#allocation2], %s354_s18 }
  0x21   : > { %514 = dma.done.wait (%p614_p8), %s168_s20, 256  }
  0x22   : > { %516 = vsyncadd (%p614_p8), %s168_s20, 4294967040  ;;  %v548_v0 = vmov 0   ;;  %v213_v1 = vld [vmem:[%s695_s1] sm:$0xff]  ;;  %v214_v2 = vld [vmem:[%s695_s1 + $0x8] sm:$0xff]  ;;  %v208_v3 = vlaneseq  ;;  %s356_s29 = sshll.u32 %s535_s12, 7  ;;  %s358_s21 = sshll.u32 %s535_s12, 3 }
  0x23   : > { %430 = vset.pattern.permute.xlu0 %v548_v0  ;;  %v211_v5 = vstv %s356_s29  ;;  %v206_v8 = vld [vmem:[%s171_s26] sm:$0xff]  ;;  %s242_s4 = scalar_lea.hbm %s696_s2, %s358_s21  ;;  %s197_s5 = scalar_lea.vmem [#allocation5], %s354_s18  ;;  %v207_v11 = vld [vmem:[%s171_s26 + $0x8] sm:$0xff] }
  0x24   : > { %217 = vperm.xlu0 %430, %v213_v1   ;;  %v209_v4 = vand.u32 127, %v208_v3  ;;  %s243_s6 = sshll.u32 %s197_s5, 4  ;;  %s245_s7 = sshll.u32 %s242_s4, 4  ;;  %s244_s6 = int_to_ptr.vmem [resolvable:$true] %s243_s6  ;;  %s246_s7 = int_to_ptr.hbm [resolvable:$true] %s245_s7 }
  0x25   : > { %s229_s12 = scalar_lea.sflag [#allocation4], %s641_s16  ;;  %s475_s8 = sshra.s32 %s246_s7, 4  ;;  %s476_s8 = int_to_ptr.hbm [resolvable:$true] %s475_s8 }
  0x26   : > { %v212_v6 = vadd.s32 %v211_v5, %v209_v4  ;;  %s477_s15 = scalar_lea.hbm %s476_s8, 16  ;;  %s481_s19 = scalar_lea.hbm %s696_s2, 32 }
  0x27   : > { %p478_p4 = scmp.ne.s32.totalorder %s476_s8, %s477_s15  ;;  %p482_p7 = scmp.lt.s32.totalorder %s476_s8, %s696_s2 }
  0x28   : > { %v215_v7 = vadd.s32 1, %v212_v6  ;;  %p483_p8 = scmp.lt.s32.totalorder %s481_s19, %s477_s15 }
  0x29   : > { %p479_p5 = pnand %p478_p4, %p618_p9 }
  0x2a   : > { %p484_p10 = por %p483_p8, %p482_p7 }
  0x2b   : > { %p480_p6 = pneg %p479_p5 }
  0x2c   : > { %220 = vperm.xlu0 %430, %v214_v2  }
  0x2d   : > { %p485_p13 = pnand %p484_p10, %p480_p6 }
  0x96   : > { %v218_v9 = vpop.permute.xlu0 %217 }
  0x97   : > { %vm222_vm0 = vcmp.lt.s32.totalorder %v215_v7, %v218_v9 }
  0x98   : > { %v224_v10 = vsel %vm222_vm0, %v206_v8, 0.0 }
  0x99   : > { %226 = vst [vmem:[%s197_s5] sm:$0xff] %v224_v10 }
  0x9e   : > { %v221_v12 = vpop.permute.xlu0 %220 }
  0x9f   : > { %vm223_vm1 = vcmp.lt.s32.totalorder %v215_v7, %v221_v12 }
  0xa0   : > { %v225_v13 = vsel %vm223_vm1, %v207_v11, 0.0 }
  0xa1   : > { %227 = vst [vmem:[%s197_s5 + $0x8] sm:$0xff] %v225_v13 }
  0xa2   : > { %488 = shalt.err (!%p485_p13)
}
  0xa3   : > { %s549_s16 = smov 128   ;;  %s550_s26 = smov 256  }
  0xa4   : > { %s551_s28 = smov 8  }
  0xa5   : > { %363 = dma.vmem_to_hbm [thread:$0]  (%p618_p9), %s244_s6, 256, %s246_s7, %s229_s12, %s549_s16, %s550_s26, %s551_s28  }
  0xa6 PF: > { %s260_s29 = sand.u32 1, %s523_s9   ;;  %p370_p0 = pnand %p350_p12, %p625_p11 }
  0xa7   : > { %s261_s21 = scalar_lea.sflag [#allocation4], %s260_s29 }
  0xa8   : > { %p371_p1 = pneg %p370_p0 }
  0xaa   : > { %518 = dma.done.wait (%p371_p1), %s261_s21, 256  }
  0xab   : > { %520 = vsyncadd (%p371_p1), %s261_s21, 4294967040  ;;  %s18_s14 = sadd.s32 1, %s543_s14   ;;  %s701_s9 = smov %s527_s10 }
  0xac   : > { %p15_p2 = scmp.ge.s32.totalorder %s18_s14, 4   ;;  %s702_s10 = smov %s531_s11 }
  0xad   : > { %s703_s11 = smov %s623_s23  ;;  %s704_s12 = smov %s539_s13 }
  0xae   : > { %s705_s13 = smov %s707_s17  ;;  %17 = sbr.rel (!%p15_p2) target bundleno = 6 (0x6), region = 76 }
  0xb3   :  { %267 = vsyncpa [#allocation3], 1 }
  0xb4   :  { %269 = vsyncpa [#allocation3 + $0x1], 1 }
  0xb5   :  { %270 = vsyncpa [#allocation4], 1 }
  0xb6   :  { %272 = vsyncpa [#allocation4 + $0x1], 1 }

</bundles_post_ra>
